<compile_context>
chip_gen: v7x
topology: tpu7x:2x2x1
jax: 0.10.0
libtpu: 0.0.40
codegen_flags: <defaults>
</compile_context>

<pallas_src>
import numpy as np
import jax
import jax.numpy as jnp
from jax import lax
from jax.experimental import pallas as pl
from jax.experimental.pallas import tpu as pltpu

# ---------------- config (mirrors the torch `config` object) ----------------
VOCAB_SIZE = 50
EMB_DIM = 32
HIDDEN_DIM = 32
N_GCN_LAYERS = 2
LANE = 128   # TPU lane width: every weight block / activation is padded to this

assert VOCAB_SIZE <= LANE and EMB_DIM <= LANE and 4 * HIDDEN_DIM <= LANE


def _vmem():
    return pl.BlockSpec(memory_space=pltpu.MemorySpace.VMEM)


def _round_up(x, m):
    return (x + m - 1) // m * m


# ------------------------------ fused Pallas kernel -------------------------------
def make_fused_kernel(n_layers, hidden_dim, npad, rpad, batch_size, offsets, bias_rows):
    H = hidden_dim

    def kernel(ids_ref, adj_ref, pscat_ref, wslab_ref, out_ref):
        # One lane-iota, reused by the one-hot compare and every layer's lane-select.
        lane_n = lax.broadcasted_iota(jnp.int32, (npad, LANE), 1)

        # Embedding lookup: in-kernel one-hot (VPU compare) + MXU matmul.
        ids = ids_ref[...]                                     # (npad, 1) int32, pad = -1
        onehot = (lane_n == ids).astype(jnp.float32)           # (npad, LANE)
        emb = wslab_ref[offsets["emb"]:offsets["emb"] + LANE, :]
        mem = jnp.dot(onehot, emb, preferred_element_type=jnp.float32)   # (npad, LANE)

        a_in = adj_ref[0:npad, :]                              # (npad, npad)
        a_out = adj_ref[npad:2 * npad, :]
        biases = wslab_ref[offsets["bias"]:offsets["bias"] + bias_rows, :]

        for l in range(n_layers):
            w_io = wslab_ref[offsets["io"][l]:offsets["io"][l] + LANE, :]
            w_fc = wslab_ref[offsets["fc"][l]:offsets["fc"][l] + LANE, :]
            b_fc = biases[l:l + 1, :]                          # (1, LANE), lanes [0,H) real
            # One matmul covers both conv directions (lanes [0,H)=W_in, [H,2H)=W_out).
            xw = jnp.dot(mem, w_io, preferred_element_type=jnp.float32)
            h_in = jnp.dot(a_in, xw, preferred_element_type=jnp.float32)
            h_out = jnp.dot(a_out, xw, preferred_element_type=jnp.float32)
            # cat([A_in X W_in, A_out X W_out], dim=1) as a pure-VPU lane select.
            h_cat = jnp.where(lane_n < H, h_in, h_out)
            # GCNConv biases are folded into b_fc (exact, pre-ReLU).
            fc = jnp.dot(h_cat, w_fc, preferred_element_type=jnp.float32) + b_fc
            mem = jnp.maximum(fc, 0.0)                         # lanes >= H stay exactly 0

        # Epilogue: global_mean_pool and to_dense_batch share one matmul
        # (pool rows stacked above scatter rows host-side); the four heads and
        # [dense_x | relu(w5)] are packed into ONE lane-dense (rpad, 128) store.
        z = jnp.dot(pscat_ref[...], mem, preferred_element_type=jnp.float32)  # (rpad, LANE)
        w_heads = wslab_ref[offsets["heads"]:offsets["heads"] + LANE, :]
        w5cat = wslab_ref[offsets["w5"]:offsets["w5"] + LANE, :]
        b_heads = biases[n_layers:n_layers + 1, :]
        b5cat = biases[n_layers + 1:n_layers + 2, :]

        y_heads = jnp.dot(z, w_heads, preferred_element_type=jnp.float32) + b_heads
        raw5 = jnp.dot(z, w5cat, preferred_element_type=jnp.float32) + b5cat
        lane_r = lax.broadcasted_iota(jnp.int32, (rpad, LANE), 1)
        row_r = lax.broadcasted_iota(jnp.int32, (rpad, LANE), 0)
        # w5cat = [I | w5]: lanes [0,H) carry dense_x (no ReLU), lanes [H,2H) carry w5.
        y_dense = jnp.where(lane_r < H, raw5, jnp.maximum(raw5, 0.0))
        out_ref[...] = jnp.where(row_r < batch_size, y_heads, y_dense)

    return kernel


# --------------------------- graph preprocessing (glue) ---------------------------
def normalized_adj(edge_index, num_nodes, flow):
    """Dense D^{-1/2}(A+I)D^{-1/2} matching torch_geometric gcn_norm for the flow."""
    src, tgt = edge_index[0], edge_index[1]
    m = np.zeros((num_nodes, num_nodes), np.float32)
    if flow == "source_to_target":
        m[tgt, src] = 1.0   # aggregate at target from source
    else:
        m[src, tgt] = 1.0   # aggregate at source from target
    m = m + np.eye(num_nodes, dtype=np.float32)
    deg = m.sum(axis=1)
    dinv = 1.0 / np.sqrt(np.maximum(deg, 1e-12))
    return (dinv[:, None] * m) * dinv[None, :]


def prepare_graph(edge_index, batch):
    batch = np.asarray(batch)
    num_nodes = int(batch.shape[0])
    B = int(batch.max()) + 1
    counts = [int((batch == b).sum()) for b in range(B)]
    max_nodes = max(counts)
    npad = _round_up(num_nodes, 8)
    mpad = _round_up(max_nodes, 8)

    # a_in stacked above a_out: one DMA, 8-aligned in-kernel row slices.
    adj = np.zeros((2 * npad, npad), np.float32)
    adj[:num_nodes, :num_nodes] = normalized_adj(edge_index, num_nodes, "source_to_target")
    adj[npad:npad + num_nodes, :num_nodes] = normalized_adj(edge_index, num_nodes, "target_to_source")

    # pool rows (global_mean_pool) stacked above scatter rows (to_dense_batch).
    rows = B + B * mpad
    rpad = _round_up(rows, 8)
    pscat = np.zeros((rpad, npad), np.float32)
    valid = np.zeros((B, max_nodes), bool)
    for b in range(B):
        idx = np.where(batch == b)[0]
        pscat[b, idx] = 1.0 / len(idx)
        for k, n in enumerate(idx):
            pscat[B + b * mpad + k, n] = 1.0
            valid[b, k] = True

    return dict(batch_size=B, num_nodes=num_nodes, max_nodes=max_nodes,
                num_nodes_pad=npad, max_nodes_pad=mpad, rows_pad=rpad,
                adj=jnp.asarray(adj), pscat=jnp.asarray(pscat),
                valid_mask=jnp.asarray(valid))


# ------------------------------ parameter init / fusion ------------------------------
def linear_params(key, d_in, d_out, scale=0.1):
    kw, kb = jax.random.split(key)
    w = jax.random.normal(kw, (d_in, d_out), jnp.float32) * scale
    b = jax.random.normal(kb, (1, d_out), jnp.float32) * scale
    return w, b


def init_params(key):
    """Raw (torch-layout-equivalent) parameters: W stored (in_dim, out_dim)."""
    keys = jax.random.split(key, 8 + 4 * N_GCN_LAYERS)
    params = {}
    params["embedding"] = jax.random.normal(keys[0], (VOCAB_SIZE, EMB_DIM), jnp.float32) * 0.1
    gcn_layers = []
    kidx = 1
    d_in = EMB_DIM
    for _ in range(N_GCN_LAYERS):
        w_in, b_in = linear_params(keys[kidx], d_in, HIDDEN_DIM); kidx += 1
        w_out, b_out = linear_params(keys[kidx], d_in, HIDDEN_DIM); kidx += 1
        w_fc, b_fc = linear_params(keys[kidx], 2 * HIDDEN_DIM, HIDDEN_DIM); kidx += 1
        gcn_layers.append(dict(w_in=w_in, b_in=b_in, w_out=w_out, b_out=b_out,
                               w_fc=w_fc, b_fc=b_fc))
        d_in = HIDDEN_DIM
    params["gcn_layers"] = gcn_layers
    for name in ["w1", "w2", "w3", "w4", "w5"]:
        w, b = linear_params(keys[kidx], HIDDEN_DIM, HIDDEN_DIM); kidx += 1
        params[name] = w
        params["b" + name[1:]] = b
    return params


def fuse_params(params):
    """Pack ALL weights/biases into one 128-lane-wide f32 slab (one input DMA)."""
    H = HIDDEN_DIM
    n_layers = len(params["gcn_layers"])

    def block(mat):
        b = np.zeros((LANE, LANE), np.float32)
        m = np.asarray(mat, np.float32)
        b[:m.shape[0], :m.shape[1]] = m
        return b

    blocks, offsets, row = [], {}, 0
    offsets["emb"] = row; blocks.append(block(params["embedding"])); row += LANE
    offsets["io"], offsets["fc"] = [], []
    for lp in params["gcn_layers"]:
        w_io = np.concatenate([np.asarray(lp["w_in"]), np.asarray(lp["w_out"])], axis=1)
        offsets["io"].append(row); blocks.append(block(w_io)); row += LANE
        offsets["fc"].append(row); blocks.append(block(lp["w_fc"])); row += LANE
    w_heads = np.concatenate([np.asarray(params[k]) for k in ("w1", "w2", "w3", "w4")], axis=1)
    offsets["heads"] = row; blocks.append(block(w_heads)); row += LANE
    w5cat = np.concatenate([np.eye(H, dtype=np.float32), np.asarray(params["w5"])], axis=1)
    offsets["w5"] = row; blocks.append(block(w5cat)); row += LANE

    bias_rows = _round_up(n_layers + 2, 8)
    bias_blk = np.zeros((bias_rows, LANE), np.float32)
    for l, lp in enumerate(params["gcn_layers"]):
        w_fc = np.asarray(lp["w_fc"])
        # Fold GCNConv biases through the fc Linear (exact, pre-ReLU).
        b_fold = (np.asarray(lp["b_fc"])
                  + np.asarray(lp["b_in"]) @ w_fc[:H]
                  + np.asarray(lp["b_out"]) @ w_fc[H:])
        bias_blk[l, :H] = b_fold[0]
    b_heads = np.concatenate([np.asarray(params[k]) for k in ("b1", "b2", "b3", "b4")], axis=1)
    bias_blk[n_layers, :4 * H] = b_heads[0]
    bias_blk[n_layers + 1, H:2 * H] = np.asarray(params["b5"])[0]
    offsets["bias"] = row; blocks.append(bias_blk); row += bias_rows

    wslab = jnp.asarray(np.concatenate(blocks, axis=0))        # (row, 128) f32
    return wslab, offsets, bias_rows


# --------------------------------- forward ----------------------------------
def gcn_encoder0_forward(node_ids, wslab, offsets, bias_rows, graph):
    H = HIDDEN_DIM
    B = graph["batch_size"]
    n = graph["num_nodes"]
    npad = graph["num_nodes_pad"]
    mpad = graph["max_nodes_pad"]
    rpad = graph["rows_pad"]
    max_nodes = graph["max_nodes"]
    n_layers = len(offsets["io"])

    # Padded node ids = -1 -> all-zero one-hot rows in-kernel.
    ids = jnp.full((npad, 1), -1, jnp.int32).at[:n, 0].set(node_ids.astype(jnp.int32))

    kernel = make_fused_kernel(n_layers, H, npad, rpad, B, offsets, bias_rows)
    out = pl.pallas_call(
        kernel,
        out_shape=jax.ShapeDtypeStruct((rpad, LANE), jnp.float32),
        in_specs=[_vmem()] * 4,
        out_specs=_vmem(),
    )(ids, graph["adj"], graph["pscat"], wslab)

    heads = out[:B]                                            # (B, 128)
    h_1 = jnp.stack([heads[:, 0 * H:1 * H], heads[:, 1 * H:2 * H]], axis=0)   # (2, B, H)
    h_2 = jnp.stack([heads[:, 2 * H:3 * H], heads[:, 3 * H:4 * H]], axis=0)   # (2, B, H)

    df = out[B:B + B * mpad].reshape(B, mpad, LANE)
    dense_x = df[:, :max_nodes, :H]                            # (B, max_nodes, H)
    encoder_feature = df[:, :max_nodes, H:2 * H].reshape(-1, H)  # (B*max_nodes, H)

    return dense_x, encoder_feature, graph["valid_mask"], (h_1, h_2)


# ----------------------------------- main ------------------------------------
if __name__ == "__main__":
    key = jax.random.PRNGKey(0)
    k_params, k_ids = jax.random.split(key)

    # synthetic batched graph (torch_geometric style): 2 graphs, 6 and 5 nodes
    nodes_per_graph = [6, 5]
    batch_size = len(nodes_per_graph)
    num_nodes = sum(nodes_per_graph)
    max_nodes = max(nodes_per_graph)
    batch_np = np.concatenate([np.full(c, b, np.int32)
                               for b, c in enumerate(nodes_per_graph)])

    # directed edges (2, E)
    edge_index = np.array(
        [[0, 1], [1, 2], [2, 3], [3, 4], [4, 5], [0, 3],
         [6, 7], [7, 8], [8, 9], [9, 10], [10, 6]], dtype=np.int32).T

    graph = prepare_graph(edge_index, batch_np)

    node_ids = jax.random.randint(k_ids, (num_nodes,), 0, VOCAB_SIZE)
    params = init_params(k_params)
    wslab, offsets, bias_rows = fuse_params(params)

    dense_x, encoder_feature, mask, (h_1, h_2) = gcn_encoder0_forward(
        node_ids, wslab, offsets, bias_rows, graph)

    jax.block_until_ready((dense_x, encoder_feature, mask, h_1, h_2))

    assert dense_x.shape == (batch_size, max_nodes, HIDDEN_DIM)
    assert encoder_feature.shape == (batch_size * max_nodes, HIDDEN_DIM)
    assert mask.shape == (batch_size, max_nodes)
    assert h_1.shape == (2, batch_size, HIDDEN_DIM)
    assert h_2.shape == (2, batch_size, HIDDEN_DIM)
    assert bool(jnp.all(jnp.isfinite(dense_x)))
    assert bool(jnp.all(jnp.isfinite(encoder_feature)))
    assert bool(jnp.all(jnp.isfinite(h_1))) and bool(jnp.all(jnp.isfinite(h_2)))
    print("KERNEL_OK")
</pallas_src>

<mosaic_0001>
module attributes {stable_mosaic.version = 11 : i64} {
  func.func @kernel(%arg0: memref<16x1xi32, #tpu.memory_space<vmem>>, %arg1: memref<32x16xf32, #tpu.memory_space<vmem>>, %arg2: memref<24x16xf32, #tpu.memory_space<vmem>>, %arg3: memref<904x128xf32, #tpu.memory_space<vmem>>, %arg4: memref<24x128xf32, #tpu.memory_space<vmem>>) attributes {dimension_semantics = [], scalar_prefetch = 0 : i64, scratch_operands = 0 : i64, tpu.core_type = #tpu.core_type<tc>} {
    %0 = tpu.iota {dimensions = array<i32: 1>} : vector<16x128xi32>
    %c0 = arith.constant 0 : index
    %c0_0 = arith.constant 0 : index
    %1 = vector.load %arg0[%c0, %c0_0] : memref<16x1xi32, #tpu.memory_space<vmem>>, vector<16x1xi32>
    %2 = vector.broadcast %1 : vector<16x1xi32> to vector<16x128xi32>
    %3 = arith.cmpi eq, %0, %2 : vector<16x128xi32>
    %4 = arith.extui %3 : vector<16x128xi1> to vector<16x128xi32>
    %5 = arith.sitofp %4 : vector<16x128xi32> to vector<16x128xf32>
    %c0_1 = arith.constant 0 : index
    %c0_2 = arith.constant 0 : index
    %6 = vector.load %arg3[%c0_1, %c0_2] : memref<904x128xf32, #tpu.memory_space<vmem>>, vector<128x128xf32>
    %cst = arith.constant dense<0.000000e+00> : vector<16x128xf32>
    %7 = tpu.matmul %5, %6, %cst {dimension_numbers = #tpu.dot_dimension_numbers<[1], [0], [0], [1], [0, 0, 1, 1], [], []>} : vector<16x128xf32>, vector<128x128xf32>, vector<16x128xf32> -> vector<16x128xf32>
    %c0_3 = arith.constant 0 : index
    %c0_4 = arith.constant 0 : index
    %8 = vector.load %arg1[%c0_3, %c0_4] : memref<32x16xf32, #tpu.memory_space<vmem>>, vector<16x16xf32>
    %c16 = arith.constant 16 : index
    %c0_5 = arith.constant 0 : index
    %9 = vector.load %arg1[%c16, %c0_5] : memref<32x16xf32, #tpu.memory_space<vmem>>, vector<16x16xf32>
    %c896 = arith.constant 896 : index
    %c0_6 = arith.constant 0 : index
    %10 = vector.load %arg3[%c896, %c0_6] : memref<904x128xf32, #tpu.memory_space<vmem>>, vector<8x128xf32>
    %c128 = arith.constant 128 : index
    %c0_7 = arith.constant 0 : index
    %11 = vector.load %arg3[%c128, %c0_7] : memref<904x128xf32, #tpu.memory_space<vmem>>, vector<128x128xf32>
    %c256 = arith.constant 256 : index
    %c0_8 = arith.constant 0 : index
    %12 = vector.load %arg3[%c256, %c0_8] : memref<904x128xf32, #tpu.memory_space<vmem>>, vector<128x128xf32>
    %13 = vector.extract_strided_slice %10 {offsets = [0, 0], sizes = [1, 128], strides = [1, 1]} : vector<8x128xf32> to vector<1x128xf32>
    %cst_9 = arith.constant dense<0.000000e+00> : vector<16x128xf32>
    %14 = tpu.matmul %7, %11, %cst_9 {dimension_numbers = #tpu.dot_dimension_numbers<[1], [0], [0], [1], [0, 0, 1, 1], [], []>} : vector<16x128xf32>, vector<128x128xf32>, vector<16x128xf32> -> vector<16x128xf32>
    %cst_10 = arith.constant dense<0.000000e+00> : vector<16x128xf32>
    %15 = tpu.matmul %8, %14, %cst_10 {dimension_numbers = #tpu.dot_dimension_numbers<[1], [0], [0], [1], [0, 0, 1, 1], [], []>} : vector<16x16xf32>, vector<16x128xf32>, vector<16x128xf32> -> vector<16x128xf32>
    %cst_11 = arith.constant dense<0.000000e+00> : vector<16x128xf32>
    %16 = tpu.matmul %9, %14, %cst_11 {dimension_numbers = #tpu.dot_dimension_numbers<[1], [0], [0], [1], [0, 0, 1, 1], [], []>} : vector<16x16xf32>, vector<16x128xf32>, vector<16x128xf32> -> vector<16x128xf32>
    %c32_i32 = arith.constant 32 : i32
    %17 = vector.broadcast %c32_i32 : i32 to vector<16x128xi32>
    %18 = arith.cmpi slt, %0, %17 : vector<16x128xi32>
    %19 = arith.select %18, %15, %16 : vector<16x128xi1>, vector<16x128xf32>
    %cst_12 = arith.constant dense<0.000000e+00> : vector<16x128xf32>
    %20 = tpu.matmul %19, %12, %cst_12 {dimension_numbers = #tpu.dot_dimension_numbers<[1], [0], [0], [1], [0, 0, 1, 1], [], []>} : vector<16x128xf32>, vector<128x128xf32>, vector<16x128xf32> -> vector<16x128xf32>
    %21 = vector.broadcast %13 : vector<1x128xf32> to vector<16x128xf32>
    %22 = arith.addf %20, %21 : vector<16x128xf32>
    %cst_13 = arith.constant 0.000000e+00 : f32
    %23 = vector.broadcast %cst_13 : f32 to vector<16x128xf32>
    %24 = arith.maximumf %22, %23 : vector<16x128xf32>
    %c384 = arith.constant 384 : index
    %c0_14 = arith.constant 0 : index
    %25 = vector.load %arg3[%c384, %c0_14] : memref<904x128xf32, #tpu.memory_space<vmem>>, vector<128x128xf32>
    %c512 = arith.constant 512 : index
    %c0_15 = arith.constant 0 : index
    %26 = vector.load %arg3[%c512, %c0_15] : memref<904x128xf32, #tpu.memory_space<vmem>>, vector<128x128xf32>
    %27 = vector.extract_strided_slice %10 {offsets = [1, 0], sizes = [1, 128], strides = [1, 1]} : vector<8x128xf32> to vector<1x128xf32>
    %cst_16 = arith.constant dense<0.000000e+00> : vector<16x128xf32>
    %28 = tpu.matmul %24, %25, %cst_16 {dimension_numbers = #tpu.dot_dimension_numbers<[1], [0], [0], [1], [0, 0, 1, 1], [], []>} : vector<16x128xf32>, vector<128x128xf32>, vector<16x128xf32> -> vector<16x128xf32>
    %cst_17 = arith.constant dense<0.000000e+00> : vector<16x128xf32>
    %29 = tpu.matmul %8, %28, %cst_17 {dimension_numbers = #tpu.dot_dimension_numbers<[1], [0], [0], [1], [0, 0, 1, 1], [], []>} : vector<16x16xf32>, vector<16x128xf32>, vector<16x128xf32> -> vector<16x128xf32>
    %cst_18 = arith.constant dense<0.000000e+00> : vector<16x128xf32>
    %30 = tpu.matmul %9, %28, %cst_18 {dimension_numbers = #tpu.dot_dimension_numbers<[1], [0], [0], [1], [0, 0, 1, 1], [], []>} : vector<16x16xf32>, vector<16x128xf32>, vector<16x128xf32> -> vector<16x128xf32>
    %c32_i32_19 = arith.constant 32 : i32
    %31 = vector.broadcast %c32_i32_19 : i32 to vector<16x128xi32>
    %32 = arith.cmpi slt, %0, %31 : vector<16x128xi32>
    %33 = arith.select %32, %29, %30 : vector<16x128xi1>, vector<16x128xf32>
    %cst_20 = arith.constant dense<0.000000e+00> : vector<16x128xf32>
    %34 = tpu.matmul %33, %26, %cst_20 {dimension_numbers = #tpu.dot_dimension_numbers<[1], [0], [0], [1], [0, 0, 1, 1], [], []>} : vector<16x128xf32>, vector<128x128xf32>, vector<16x128xf32> -> vector<16x128xf32>
    %35 = vector.broadcast %27 : vector<1x128xf32> to vector<16x128xf32>
    %36 = arith.addf %34, %35 : vector<16x128xf32>
    %cst_21 = arith.constant 0.000000e+00 : f32
    %37 = vector.broadcast %cst_21 : f32 to vector<16x128xf32>
    %38 = arith.maximumf %36, %37 : vector<16x128xf32>
    %c0_22 = arith.constant 0 : index
    %c0_23 = arith.constant 0 : index
    %39 = vector.load %arg2[%c0_22, %c0_23] : memref<24x16xf32, #tpu.memory_space<vmem>>, vector<24x16xf32>
    %cst_24 = arith.constant dense<0.000000e+00> : vector<24x128xf32>
    %40 = tpu.matmul %39, %38, %cst_24 {dimension_numbers = #tpu.dot_dimension_numbers<[1], [0], [0], [1], [0, 0, 1, 1], [], []>} : vector<24x16xf32>, vector<16x128xf32>, vector<24x128xf32> -> vector<24x128xf32>
    %c640 = arith.constant 640 : index
    %c0_25 = arith.constant 0 : index
    %41 = vector.load %arg3[%c640, %c0_25] : memref<904x128xf32, #tpu.memory_space<vmem>>, vector<128x128xf32>
    %c768 = arith.constant 768 : index
    %c0_26 = arith.constant 0 : index
    %42 = vector.load %arg3[%c768, %c0_26] : memref<904x128xf32, #tpu.memory_space<vmem>>, vector<128x128xf32>
    %43 = vector.extract_strided_slice %10 {offsets = [2, 0], sizes = [1, 128], strides = [1, 1]} : vector<8x128xf32> to vector<1x128xf32>
    %44 = vector.extract_strided_slice %10 {offsets = [3, 0], sizes = [1, 128], strides = [1, 1]} : vector<8x128xf32> to vector<1x128xf32>
    %cst_27 = arith.constant dense<0.000000e+00> : vector<24x128xf32>
    %45 = tpu.matmul %40, %41, %cst_27 {dimension_numbers = #tpu.dot_dimension_numbers<[1], [0], [0], [1], [0, 0, 1, 1], [], []>} : vector<24x128xf32>, vector<128x128xf32>, vector<24x128xf32> -> vector<24x128xf32>
    %46 = vector.broadcast %43 : vector<1x128xf32> to vector<24x128xf32>
    %47 = arith.addf %45, %46 : vector<24x128xf32>
    %cst_28 = arith.constant dense<0.000000e+00> : vector<24x128xf32>
    %48 = tpu.matmul %40, %42, %cst_28 {dimension_numbers = #tpu.dot_dimension_numbers<[1], [0], [0], [1], [0, 0, 1, 1], [], []>} : vector<24x128xf32>, vector<128x128xf32>, vector<24x128xf32> -> vector<24x128xf32>
    %49 = vector.broadcast %44 : vector<1x128xf32> to vector<24x128xf32>
    %50 = arith.addf %48, %49 : vector<24x128xf32>
    %51 = tpu.iota {dimensions = array<i32: 1>} : vector<24x128xi32>
    %52 = tpu.iota {dimensions = array<i32: 0>} : vector<24x128xi32>
    %c32_i32_29 = arith.constant 32 : i32
    %53 = vector.broadcast %c32_i32_29 : i32 to vector<24x128xi32>
    %54 = arith.cmpi slt, %51, %53 : vector<24x128xi32>
    %cst_30 = arith.constant 0.000000e+00 : f32
    %55 = vector.broadcast %cst_30 : f32 to vector<24x128xf32>
    %56 = arith.maximumf %50, %55 : vector<24x128xf32>
    %57 = arith.select %54, %50, %56 : vector<24x128xi1>, vector<24x128xf32>
    %c2_i32 = arith.constant 2 : i32
    %58 = vector.broadcast %c2_i32 : i32 to vector<24x128xi32>
    %59 = arith.cmpi slt, %52, %58 : vector<24x128xi32>
    %60 = arith.select %59, %47, %57 : vector<24x128xi1>, vector<24x128xf32>
    %c0_31 = arith.constant 0 : index
    %c0_32 = arith.constant 0 : index
    %61 = vector.load %arg4[%c0_31, %c0_32] : memref<24x128xf32, #tpu.memory_space<vmem>>, vector<24x128xf32>
    tpu.vector_store %arg4[%c0_31, %c0_32], %60 {strides = array<i32>} : memref<24x128xf32, #tpu.memory_space<vmem>>, vector<24x128xf32>,
    return
  }
}

</mosaic_0001>

<bundles_post_ra>
// kernel: tpu_custom_call.1
= control target key start
LH: loop header
LB: loop body
LE: loop exit
PB: predicated region body
PF: predicated region fallthrough
CT: control target
= control target key end

     0   :  { %9 = vsyncpa [#allocation3], 0  ;;  %s2100_s0 = inlined_call_operand.vmem [shape: s32[16,1], index: 0, kind: input, shape index: {}]   ;;  %s2101_s1 = inlined_call_operand.vmem [shape: f32[32,16], index: 1, kind: input, shape index: {}]   ;;  %s2102_s2 = inlined_call_operand.vmem [shape: f32[24,16], index: 2, kind: input, shape index: {}]   ;;  %s2103_s3 = inlined_call_operand.hbm [shape: f32[904,128], index: 3, kind: input, shape index: {}]   ;;  %s2104_s4 = inlined_call_operand.hbm [shape: f32[24,128], index: 4, kind: output, shape index: {}]  }
   0x1   :  { %10 = vsyncpa [#allocation4], 0  ;;  %s1913_s15 = smov [#allocation2]   ;;  %s1865_s19 = scalar_lea.hbm %s2103_s3, 14464 }
   0x2   :  { %s22_s16 = sshll.u32 %s1913_s15, 4  ;;  %p1866_p0 = scmp.ne.s32.totalorder %s2103_s3, %s1865_s19  ;;  %s23_s16 = int_to_ptr.vmem [resolvable:$true] %s22_s16 }
   0x3   :  { %p1869_p1 = scmp.lt.u32.totalorder %s1865_s19, %s2103_s3 }
   0x5   :  { %p1871_p2 = pnand %p1869_p1, %p1866_p0 }
   0x7   :  { %1874 = shalt.err (!%p1871_p2)
}
   0x8   :  { %s1875_s24 = scalar_lea.vmem %s23_s16, 14464  ;;  %p1880_p4 = scmp.lt.s32.totalorder %s23_s16, %s23_s16 }
   0x9   :  { %p1876_p3 = scmp.ne.s32.totalorder %s23_s16, %s1875_s24  ;;  %p1881_p5 = scmp.lt.s32.totalorder %s1875_s24, %s1875_s24 }
   0xb   :  { %p1882_p6 = por %p1881_p5, %p1880_p4 }
   0xd   :  { %p1883_p7 = pnand %p1882_p6, %p1876_p3 }
   0xf   :  { %1886 = shalt.err (!%p1883_p7)
}
  0x10   :  { %s1914_s25 = smov 128   ;;  %s1915_s26 = smov 8  }
  0x11   :  { %28 = dma.hbm_to_vmem [thread:$0]  %s2103_s3, 14464, %s23_s16, [#allocation3], %s1914_s25, %s1914_s25, %s1915_s26  }
  0x12   :  { %1909 = dma.done.wait [#allocation3], 14464  }
  0x13   :  { %1910 = vsyncadd [#allocation3], 4294952832  ;;  %v1916_v0 = vmov 0   ;;  %v34_v1 = vld [vmem:[%s2100_s0] sm:$0xff]  ;;  %v49_v3 = vld [vmem:[#allocation2 + $0x8] sm:$0xff]  ;;  %v32_v51 = vlaneseq  ;;  %v1917_v54 = vmov 1.0  }
  0x14   :  { %1864 = vset.pattern.permute.xlu0 %v1916_v0  ;;  %v48_v2 = vld [vmem:[#allocation2] sm:$0xff]  ;;  %v50_v4 = vld [vmem:[#allocation2 + $0x10] sm:$0xff]  ;;  %v51_v5 = vld [vmem:[#allocation2 + $0x18] sm:$0xff]  ;;  %vm251_vm2 = vcmask 130048   ;;  %vm1919_vm4 = vmmov 0  }
  0x15   :  { %37 = vperm.xlu0 %1864, %v34_v1   ;;  %v35_v6 = vld [vmem:[%s2100_s0 + $0x8] sm:$0xff]  ;;  %v1628_v7 = vpack.c.bf16 %v49_v3, %v48_v2  ;;  %v1632_v8 = vpack.c.bf16 %v51_v5, %v50_v4  ;;  %v52_v9 = vld [vmem:[#allocation2 + $0x20] sm:$0xff]  ;;  %v146_v14 = vld [vmem:[#allocation2 + $0x90] sm:$0xff]  ;;  %v1969_v52 = vand.u32 127, %v32_v51 }
  0x16   :  { %v53_v10 = vld [vmem:[#allocation2 + $0x28] sm:$0xff]  ;;  %v144_v12 = vld [vmem:[#allocation2 + $0x80] sm:$0xff]  ;;  %v54_v15 = vld [vmem:[#allocation2 + $0x30] sm:$0xff] }
  0x17   :  { %1629 = vmatprep.subr.bf16.mxu0 %v1628_v7  ;;  %v1636_v11 = vpack.c.bf16 %v53_v10, %v52_v9  ;;  %v145_v13 = vld [vmem:[#allocation2 + $0x88] sm:$0xff]  ;;  %v55_v16 = vld [vmem:[#allocation2 + $0x38] sm:$0xff]  ;;  %v148_v20 = vld [vmem:[#allocation2 + $0xa0] sm:$0xff]  ;;  %vm414_vm3 = vcmp.lt.s32.totalorder %v1969_v52, 32 }
  0x18   :  { %1631 = vmatpush3.bf16.msra.mxu0 %v1628_v7  ;;  %v1660_v17 = vpack.c.bf16 %v145_v13, %v144_v12  ;;  %v147_v18 = vld [vmem:[#allocation2 + $0x98] sm:$0xff]  ;;  %v149_v21 = vld [vmem:[#allocation2 + $0xa8] sm:$0xff]  ;;  %v1640_v22 = vpack.c.bf16 %v55_v16, %v54_v15  ;;  %v56_v23 = vld [vmem:[#allocation2 + $0x40] sm:$0xff] }
  0x19   :  { %40 = vperm.xlu0 %1864, %v35_v6   ;;  %1633 = vmatprep.subr.bf16.mxu0 %v1632_v8  ;;  %v1664_v19 = vpack.c.bf16 %v147_v18, %v146_v14  ;;  %v57_v24 = vld [vmem:[#allocation2 + $0x48] sm:$0xff]  ;;  %v1668_v25 = vpack.c.bf16 %v149_v21, %v148_v20  ;;  %v150_v26 = vld [vmem:[#allocation2 + $0xb0] sm:$0xff]  ;;  %v151_v27 = vld [vmem:[#allocation2 + $0xb8] sm:$0xff] }
  0x1a   :  { %1661 = vmatprep.subr.bf16.mxu1 %v1660_v17  ;;  %v1644_v28 = vpack.c.bf16 %v57_v24, %v56_v23  ;;  %v58_v29 = vld [vmem:[#allocation2 + $0x50] sm:$0xff]  ;;  %v59_v30 = vld [vmem:[#allocation2 + $0x58] sm:$0xff]  ;;  %v1672_v31 = vpack.c.bf16 %v151_v27, %v150_v26  ;;  %v152_v32 = vld [vmem:[#allocation2 + $0xc0] sm:$0xff] }
  0x1b   :  { %1663 = vmatpush3.bf16.msra.mxu1 %v1660_v17  ;;  %v153_v33 = vld [vmem:[#allocation2 + $0xc8] sm:$0xff]  ;;  %v1648_v34 = vpack.c.bf16 %v59_v30, %v58_v29  ;;  %v60_v35 = vld [vmem:[#allocation2 + $0x60] sm:$0xff]  ;;  %v154_v38 = vld [vmem:[#allocation2 + $0xd0] sm:$0xff] }
  0x1c   :  { %1635 = vmatpush3.bf16.msra.mxu0 %v1632_v8  ;;  %1665 = vmatprep.subr.bf16.mxu1 %v1664_v19  ;;  %v61_v36 = vld [vmem:[#allocation2 + $0x68] sm:$0xff]  ;;  %v1676_v37 = vpack.c.bf16 %v153_v33, %v152_v32  ;;  %v155_v39 = vld [vmem:[#allocation2 + $0xd8] sm:$0xff]  ;;  %v62_v41 = vld [vmem:[#allocation2 + $0x70] sm:$0xff] }
  0x1d   :  { %1637 = vmatprep.subr.bf16.mxu0 %v1636_v11  ;;  %v1652_v40 = vpack.c.bf16 %v61_v36, %v60_v35  ;;  %v63_v42 = vld [vmem:[#allocation2 + $0x78] sm:$0xff]  ;;  %v1680_v43 = vpack.c.bf16 %v155_v39, %v154_v38  ;;  %v156_v44 = vld [vmem:[#allocation2 + $0xe0] sm:$0xff]  ;;  %v157_v45 = vld [vmem:[#allocation2 + $0xe8] sm:$0xff] }
  0x1e   :  { %v1656_v46 = vpack.c.bf16 %v63_v42, %v62_v41  ;;  %v1684_v47 = vpack.c.bf16 %v157_v45, %v156_v44  ;;  %v158_v48 = vld [vmem:[#allocation2 + $0xf0] sm:$0xff]  ;;  %v159_v49 = vld [vmem:[#allocation2 + $0xf8] sm:$0xff]  ;;  %v1976_v58 = vld [vmem:[%s2101_s1] sm:$0xff] }
  0x1f   :  { %1667 = vmatpush3.bf16.msra.mxu1 %v1664_v19  ;;  %v1688_v50 = vpack.c.bf16 %v159_v49, %v158_v48  ;;  %v160_v59 = vld [vmem:[#allocation2 + $0x100] sm:$0xff]  ;;  %v161_v60 = vld [vmem:[#allocation2 + $0x108] sm:$0xff]  ;;  %v162_v61 = vld [vmem:[#allocation2 + $0x110] sm:$0xff] }
  0x20   :  { %1639 = vmatpush3.bf16.msra.mxu0 %v1636_v11  ;;  %1669 = vmatprep.subr.bf16.mxu1 %v1668_v25  ;;  %v1700_v62 = vpack.c.bf16 %v161_v60, %v160_v59  ;;  %v163_v63 = vld [vmem:[#allocation2 + $0x118] sm:$0xff]  ;;  %v164_v1 = vld [vmem:[#allocation2 + $0x120] sm:$0xff]  ;;  %v165_v2 = vld [vmem:[#allocation2 + $0x128] sm:$0xff] }
  0x21   :  { %1641 = vmatprep.subr.bf16.mxu0 %v1640_v22  ;;  %v1704_v0 = vpack.c.bf16 %v163_v63, %v162_v61  ;;  %v1708_v3 = vpack.c.bf16 %v165_v2, %v164_v1  ;;  %v166_v4 = vld [vmem:[#allocation2 + $0x130] sm:$0xff]  ;;  %v167_v5 = vld [vmem:[#allocation2 + $0x138] sm:$0xff]  ;;  %v168_v7 = vld [vmem:[#allocation2 + $0x140] sm:$0xff] }
  0x22   :  { %v1712_v6 = vpack.c.bf16 %v167_v5, %v166_v4  ;;  %v169_v8 = vld [vmem:[#allocation2 + $0x148] sm:$0xff]  ;;  %v170_v10 = vld [vmem:[#allocation2 + $0x150] sm:$0xff]  ;;  %v171_v11 = vld [vmem:[#allocation2 + $0x158] sm:$0xff] }
  0x23   :  { %1671 = vmatpush3.bf16.msra.mxu1 %v1668_v25  ;;  %v1716_v9 = vpack.c.bf16 %v169_v8, %v168_v7  ;;  %v1720_v12 = vpack.c.bf16 %v171_v11, %v170_v10  ;;  %v1983_v16 = vld [vmem:[%s2101_s1 + $0x8] sm:$0xff]  ;;  %v1988_v17 = vld [vmem:[%s2101_s1 + $0x10] sm:$0xff]  ;;  %v1997_v18 = vld [vmem:[%s2101_s1 + $0x18] sm:$0xff] }
  0x24   :  { %1643 = vmatpush3.bf16.msra.mxu0 %v1640_v22  ;;  %1673 = vmatprep.subr.bf16.mxu1 %v1672_v31  ;;  %v172_v19 = vld [vmem:[#allocation2 + $0x160] sm:$0xff]  ;;  %v173_v20 = vld [vmem:[#allocation2 + $0x168] sm:$0xff]  ;;  %v174_v22 = vld [vmem:[#allocation2 + $0x170] sm:$0xff] }
  0x25   :  { %1645 = vmatprep.subr.bf16.mxu0 %v1644_v28  ;;  %v1724_v21 = vpack.c.bf16 %v173_v20, %v172_v19  ;;  %v175_v23 = vld [vmem:[#allocation2 + $0x178] sm:$0xff]  ;;  %v498_v25 = vld [vmem:[#allocation2 + $0x180] sm:$0xff]  ;;  %v499_v26 = vld [vmem:[#allocation2 + $0x188] sm:$0xff] }
  0x26   :  { %v1728_v24 = vpack.c.bf16 %v175_v23, %v174_v22  ;;  %v500_v27 = vld [vmem:[#allocation2 + $0x190] sm:$0xff]  ;;  %v501_v29 = vld [vmem:[#allocation2 + $0x198] sm:$0xff]  ;;  %v503_v32 = vld [vmem:[#allocation2 + $0x1a8] sm:$0xff] }
  0x27   :  { %1675 = vmatpush3.bf16.msra.mxu1 %v1672_v31  ;;  %v1736_v30 = vpack.c.bf16 %v501_v29, %v500_v27  ;;  %v502_v31 = vld [vmem:[#allocation2 + $0x1a0] sm:$0xff]  ;;  %v505_v35 = vld [vmem:[#allocation2 + $0x1b8] sm:$0xff]  ;;  %v507_v38 = vld [vmem:[#allocation2 + $0x1c8] sm:$0xff] }
  0x28   :  { %1647 = vmatpush3.bf16.msra.mxu0 %v1644_v28  ;;  %1677 = vmatprep.subr.bf16.mxu1 %v1676_v37  ;;  %v1732_v28 = vpack.c.bf16 %v499_v26, %v498_v25  ;;  %v1740_v33 = vpack.c.bf16 %v503_v32, %v502_v31  ;;  %v509_v41 = vld [vmem:[#allocation2 + $0x1d8] sm:$0xff]  ;;  %v511_v44 = vld [vmem:[#allocation2 + $0x1e8] sm:$0xff]  ;;  %v2010_v60 = vld [vmem:[#allocation2 + $0x380] sm:$0xff] }
  0x29   :  { %1649 = vmatprep.subr.bf16.mxu0 %v1648_v34  ;;  %v514_v4 = vld [vmem:[#allocation2 + $0x200] sm:$0xff]  ;;  %v516_v5 = vld [vmem:[#allocation2 + $0x210] sm:$0xff]  ;;  %v517_v7 = vld [vmem:[#allocation2 + $0x218] sm:$0xff] }
  0x2a   :  { %v1776_v8 = vpack.c.bf16 %v517_v7, %v516_v5  ;;  %v519_v10 = vld [vmem:[#allocation2 + $0x228] sm:$0xff]  ;;  %v524_v20 = vld [vmem:[#allocation2 + $0x250] sm:$0xff]  ;;  %v526_v26 = vld [vmem:[#allocation2 + $0x260] sm:$0xff] }
  0x2b   :  { %1679 = vmatpush3.bf16.msra.mxu1 %v1676_v37  ;;  %v506_v37 = vld [vmem:[#allocation2 + $0x1c0] sm:$0xff]  ;;  %v523_v19 = vld [vmem:[#allocation2 + $0x248] sm:$0xff]  ;;  %v528_v29 = vld [vmem:[#allocation2 + $0x270] sm:$0xff] }
  0x2c   :  { %1651 = vmatpush3.bf16.msra.mxu0 %v1648_v34  ;;  %1681 = vmatprep.subr.bf16.mxu1 %v1680_v43  ;;  %v504_v34 = vld [vmem:[#allocation2 + $0x1b0] sm:$0xff]  ;;  %v1748_v39 = vpack.c.bf16 %v507_v38, %v506_v37  ;;  %v527_v27 = vld [vmem:[#allocation2 + $0x268] sm:$0xff]  ;;  %v946_v37 = vld [vmem:[#allocation2 + $0x300] sm:$0xff] }
  0x2d   :  { %1653 = vmatprep.subr.bf16.mxu0 %v1652_v40  ;;  %v1744_v36 = vpack.c.bf16 %v505_v35, %v504_v34  ;;  %v1918_v35 = vmov 0.0|0.0   ;;  %v947_v38 = vld [vmem:[#allocation2 + $0x308] sm:$0xff] }
  0x2f   :  { %1683 = vmatpush3.bf16.msra.mxu1 %v1680_v43  ;;  %v510_v43 = vld [vmem:[#allocation2 + $0x1e0] sm:$0xff] }
  0x30   :  { %1655 = vmatpush3.bf16.msra.mxu0 %v1652_v40  ;;  %1685 = vmatprep.subr.bf16.mxu1 %v1684_v47  ;;  %v508_v40 = vld [vmem:[#allocation2 + $0x1d0] sm:$0xff]  ;;  %v1756_v45 = vpack.c.bf16 %v511_v44, %v510_v43  ;;  %v950_v43 = vld [vmem:[#allocation2 + $0x320] sm:$0xff]  ;;  %v951_v44 = vld [vmem:[#allocation2 + $0x328] sm:$0xff] }
  0x31   :  { %1657 = vmatprep.subr.bf16.mxu0 %v1656_v46  ;;  %v1752_v42 = vpack.c.bf16 %v509_v41, %v508_v40  ;;  %v948_v40 = vld [vmem:[#allocation2 + $0x310] sm:$0xff]  ;;  %v949_v41 = vld [vmem:[#allocation2 + $0x318] sm:$0xff] }
  0x33   :  { %1687 = vmatpush3.bf16.msra.mxu1 %v1684_v47 }
  0x34   :  { %1659 = vmatpush3.bf16.msra.mxu0 %v1656_v46  ;;  %1689 = vmatprep.subr.bf16.mxu1 %v1688_v50 }
  0x35   :  { %1701 = vmatprep.subr.bf16.mxu0 %v1700_v62 }
  0x37   :  { %1691 = vmatpush3.bf16.msra.mxu1 %v1688_v50 }
  0x94   :  { %v38_v53 = vpop.permute.xlu0 %37 }
  0x95   :  { %vm42_vm0 = vcmp.eq.s32.totalorder %v1969_v52, %v38_v53 }
  0x96   :  { %1362 = vmatprep.mubr.msk.f32.mxu0 %vm42_vm0, %v1917_v54 }
  0x98   :  { %v41_v55 = vpop.permute.xlu0 %40 }
  0x99   :  { %vm43_vm1 = vcmp.eq.s32.totalorder %v1969_v52, %v41_v55  ;;  %v513_v55 = vld [vmem:[#allocation2 + $0x1f8] sm:$0xff] }
  0x9a   :  { %1363 = vmatmul.mubr.msk.f32.vlgmr.msra.gmra.mrb[0].mxu0 %vm43_vm1, %v1917_v54  ;;  %v512_v54 = vld [vmem:[#allocation2 + $0x1f0] sm:$0xff] }
  0x9b   :  { %1703 = vmatpush3.bf16.msra.mxu0 %v1700_v62 }
  0x9c   :  { %1705 = vmatprep.subr.bf16.mxu0 %v1704_v0 }
  0x9f   :  { %1707 = vmatpush3.bf16.msra.mxu0 %v1704_v0 }
  0xa0   :  { %1709 = vmatprep.subr.bf16.mxu0 %v1708_v3 }
  0xa3   :  { %1711 = vmatpush3.bf16.msra.mxu0 %v1708_v3 }
  0xa4   :  { %1713 = vmatprep.subr.bf16.mxu0 %v1712_v6 }
  0xa7   :  { %1715 = vmatpush3.bf16.msra.mxu0 %v1712_v6 }
  0xa8   :  { %1717 = vmatprep.subr.bf16.mxu0 %v1716_v9 }
  0xab   :  { %1719 = vmatpush3.bf16.msra.mxu0 %v1716_v9  ;;  %v518_v9 = vld [vmem:[#allocation2 + $0x220] sm:$0xff] }
  0xac   :  { %1721 = vmatprep.subr.bf16.mxu0 %v1720_v12  ;;  %v1780_v11 = vpack.c.bf16 %v519_v10, %v518_v9  ;;  %v930_v9 = vld [vmem:[#allocation2 + $0x280] sm:$0xff]  ;;  %v931_v10 = vld [vmem:[#allocation2 + $0x288] sm:$0xff] }
  0xaf   :  { %1723 = vmatpush3.bf16.msra.mxu0 %v1720_v12  ;;  %v520_v12 = vld [vmem:[#allocation2 + $0x230] sm:$0xff] }
  0xb0   :  { %1725 = vmatprep.subr.bf16.mxu0 %v1724_v21 }
  0xb3   :  { %1727 = vmatpush3.bf16.msra.mxu0 %v1724_v21  ;;  %v525_v21 = vld [vmem:[#allocation2 + $0x258] sm:$0xff] }
  0xb4   :  { %1729 = vmatprep.subr.bf16.mxu0 %v1728_v24  ;;  %v1792_v22 = vpack.c.bf16 %v525_v21, %v524_v20  ;;  %v934_v20 = vld [vmem:[#allocation2 + $0x2a0] sm:$0xff]  ;;  %v935_v21 = vld [vmem:[#allocation2 + $0x2a8] sm:$0xff] }
  0xb7   :  { %1731 = vmatpush3.bf16.msra.mxu0 %v1728_v24 }
 0x16d   :  { %v1364_v56 = vpop.f32.mrb[0].mxu0 }
 0x16e   :  { %v130_v57 = vpop.f32.mrb[1].mxu0 }
 0x16f   :  { %1397 = vmatprep.mubr.f32.mxu1 %v130_v57  ;;  %v2007_v57 = vshrl.u32 %v32_v51, 7  ;;  %v515_v51 = vld [vmem:[#allocation2 + $0x208] sm:$0xff] }
 0x170   :  { %1398 = vmatmul.mubr.f32.vlgmr.msra.gmra.mrb[0].mxu1 %v1364_v56  ;;  %v1760_v56 = vpack.c.bf16 %v513_v55, %v512_v54  ;;  %v1772_v6 = vpack.c.bf16 %v515_v51, %v514_v4  ;;  %v956_v54 = vld [vmem:[#allocation2 + $0x350] sm:$0xff]  ;;  %v957_v55 = vld [vmem:[#allocation2 + $0x358] sm:$0xff] }
 0x171   :  { %1404 = vmatprep.mubr.msk.f32.mxu1 %vm251_vm2, %v1976_v58  ;;  %v419_v59 = vsub.s32 0, %v2007_v57  ;;  %vm1140_vm5 = vcmp.lt.s32.totalorder %v2007_v57, 2 }
 0x172   :  { %1773 = vmatprep.subr.bf16.mxu0 %v1772_v6 }
 0x173   :  { %v420_v61 = vrot.slane %v2010_v60, %v419_v59  ;;  %v958_v59 = vld [vmem:[#allocation2 + $0x360] sm:$0xff] }
 0x243   :  { %v1399_v13 = vpop.f32.mrb[0].mxu1 }
 0x244   :  { %v242_v14 = vpop.f32.mrb[1].mxu1 }
 0x245   :  { %v1692_v15 = vpack.c.bf16 %v1399_v13, %v242_v14  ;;  %v521_v13 = vld [vmem:[#allocation2 + $0x238] sm:$0xff] }
 0x246   :  { %v1784_v14 = vpack.c.bf16 %v521_v13, %v520_v12  ;;  %v838_v12 = vld [vmem:[%s2102_s2] sm:$0xff]  ;;  %v1808_v13 = vpack.c.bf16 %v931_v10, %v930_v9 }
 0x247   :  { %1693 = vmatprep.subr.bf16.mxu1 %v1692_v15 }
 0x248   :  { %1695 = vmatpush3.bf16.msra.mxu1 %v1692_v15 }
 0x249   :  { %1697 = vmatprep.subr.bf16.mxu1 %v1692_v15 }
 0x24b   :  { %1405 = vmatmul.mubr.msk.f32.vlgmr.msra.gmra.mrb[2].mxu1 %vm251_vm2, %v1983_v16 }
 0x24c   :  { %1699 = vmatpush3.bf16.msra.mxu1 %v1692_v15  ;;  %1411 = vmatprep.mubr.msk.f32.mxu1 %vm251_vm2, %v1988_v17  ;;  %v522_v15 = vld [vmem:[#allocation2 + $0x240] sm:$0xff] }
 0x24d   :  { %1733 = vmatprep.subr.bf16.mxu1 %v1732_v28 }
 0x24f   :  { %1412 = vmatmul.mubr.msk.f32.vlgmr.msra.gmra.mrb[4].mxu1 %vm251_vm2, %v1997_v18 }
 0x250   :  { %1735 = vmatpush3.bf16.msra.mxu1 %v1732_v28  ;;  %v1796_v28 = vpack.c.bf16 %v527_v27, %v526_v26  ;;  %v938_v27 = vld [vmem:[#allocation2 + $0x2c0] sm:$0xff] }
 0x251   :  { %1737 = vmatprep.subr.bf16.mxu1 %v1736_v30 }
 0x254   :  { %1739 = vmatpush3.bf16.msra.mxu1 %v1736_v30  ;;  %v529_v30 = vld [vmem:[#allocation2 + $0x278] sm:$0xff] }
 0x255   :  { %1741 = vmatprep.subr.bf16.mxu1 %v1740_v33  ;;  %v1800_v31 = vpack.c.bf16 %v529_v30, %v528_v29  ;;  %v940_v30 = vld [vmem:[#allocation2 + $0x2d0] sm:$0xff] }
 0x258   :  { %1743 = vmatpush3.bf16.msra.mxu1 %v1740_v33 }
 0x259   :  { %1745 = vmatprep.subr.bf16.mxu1 %v1744_v36 }
 0x25c   :  { %1747 = vmatpush3.bf16.msra.mxu1 %v1744_v36  ;;  %v1920_v36 = vmov 0.0  }
 0x25d   :  { %1749 = vmatprep.subr.bf16.mxu1 %v1748_v39 }
 0x260   :  { %1751 = vmatpush3.bf16.msra.mxu1 %v1748_v39  ;;  %v1832_v39 = vpack.c.bf16 %v947_v38, %v946_v37 }
 0x261   :  { %1753 = vmatprep.subr.bf16.mxu1 %v1752_v42 }
 0x264   :  { %1755 = vmatpush3.bf16.msra.mxu1 %v1752_v42  ;;  %v1835_v42 = vpack.c.bf16 %v949_v41, %v948_v40 }
 0x265   :  { %1757 = vmatprep.subr.bf16.mxu1 %v1756_v45 }
 0x268   :  { %1759 = vmatpush3.bf16.msra.mxu1 %v1756_v45  ;;  %v1838_v45 = vpack.c.bf16 %v951_v44, %v950_v43  ;;  %v1048_v43 = vsub.s32 3, %v2007_v57  ;;  %v964_v44 = vsub.s32 2, %v2007_v57 }
 0x269   :  { %1761 = vmatprep.subr.bf16.mxu1 %v1760_v56 }
 0x26c   :  { %1763 = vmatpush3.bf16.msra.mxu1 %v1760_v56  ;;  %v1847_v56 = vpack.c.bf16 %v957_v55, %v956_v54 }
 0x31e   :  { %v1406_v46 = vpop.f32.mrb[2].mxu1 }
 0x31f   :  { %v324_v47 = vpop.f32.mrb[3].mxu1 }
 0x322   :  { %v1413_v48 = vpop.f32.mrb[4].mxu1 }
 0x323   :  { %v416_v49 = vsel %vm414_vm3, %v1406_v46, %v1413_v48  ;;  %v405_v50 = vpop.f32.mrb[5].mxu1  ;;  %v952_v46 = vld [vmem:[#allocation2 + $0x330] sm:$0xff] }
 0x324   :  { %v415_v53 = vsel %vm414_vm3, %v324_v47, %v405_v50  ;;  %v953_v47 = vld [vmem:[#allocation2 + $0x338] sm:$0xff]  ;;  %v955_v50 = vld [vmem:[#allocation2 + $0x348] sm:$0xff] }
 0x325   :  { %1446 = vmatprep.mubr.f32.mxu0 %v415_v53  ;;  %v1841_v48 = vpack.c.bf16 %v953_v47, %v952_v46  ;;  %v965_v46 = vrot.slane %v2010_v60, %v964_v44 }
 0x326   :  { %1447 = vmatmul.mubr.f32.vlgmr.msra.gmra.mrb[2].mxu0 %v416_v49  ;;  %v954_v49 = vld [vmem:[#allocation2 + $0x340] sm:$0xff] }
 0x327   :  { %1775 = vmatpush3.bf16.msra.mxu0 %v1772_v6  ;;  %v1844_v53 = vpack.c.bf16 %v955_v50, %v954_v49 }
 0x328   :  { %1777 = vmatprep.subr.bf16.mxu0 %v1776_v8 }
 0x32b   :  { %1779 = vmatpush3.bf16.msra.mxu0 %v1776_v8 }
 0x32c   :  { %1781 = vmatprep.subr.bf16.mxu0 %v1780_v11 }
 0x32f   :  { %1783 = vmatpush3.bf16.msra.mxu0 %v1780_v11 }
 0x330   :  { %1785 = vmatprep.subr.bf16.mxu0 %v1784_v14 }
 0x333   :  { %1787 = vmatpush3.bf16.msra.mxu0 %v1784_v14  ;;  %v932_v14 = vld [vmem:[#allocation2 + $0x290] sm:$0xff] }
 0x3f9   :  { %v1448_v62 = vpop.f32.mrb[2].mxu0 }
 0x3fa   :  { %v493_v63 = vadd.f32 %v1448_v62, %v420_v61  ;;  %v487_v0 = vpop.f32.mrb[3].mxu0 }
 0x3fb   :  { %v488_v1 = vadd.f32 %v487_v0, %v420_v61  ;;  %v959_v61 = vld [vmem:[#allocation2 + $0x368] sm:$0xff]  ;;  %v961_v0 = vld [vmem:[#allocation2 + $0x378] sm:$0xff] }
 0x3fc   :  { %v497_v3 = vmax.f32 %v493_v63, 0.0  ;;  %v1850_v62 = vpack.c.bf16 %v959_v61, %v958_v59  ;;  %v960_v63 = vld [vmem:[#allocation2 + $0x370] sm:$0xff] }
 0x3fd   :  { %v496_v2 = vmax.f32 %v488_v1, 0.0  ;;  %v1853_v1 = vpack.c.bf16 %v961_v0, %v960_v63 }
 0x3ff   :  { %1481 = vmatprep.mubr.f32.mxu1 %v496_v2  ;;  %v759_v2 = vsub.s32 1, %v2007_v57 }
 0x400   :  { %1482 = vmatmul.mubr.f32.vlgmr.msra.gmra.mrb[6].mxu1 %v497_v3 }
 0x401   :  { %1488 = vmatprep.mubr.msk.f32.mxu1 %vm251_vm2, %v1976_v58  ;;  %v1788_v58 = vpack.c.bf16 %v523_v19, %v522_v15  ;;  %v760_v3 = vrot.slane %v2010_v60, %v759_v2  ;;  %v933_v15 = vld [vmem:[#allocation2 + $0x298] sm:$0xff]  ;;  %v839_v19 = vld [vmem:[%s2102_s2 + $0x8] sm:$0xff] }
 0x403   :  { %1789 = vmatprep.subr.bf16.mxu0 %v1788_v58 }
 0x404   :  { %1791 = vmatpush3.bf16.msra.mxu0 %v1788_v58  ;;  %v1811_v58 = vpack.c.bf16 %v933_v15, %v932_v14 }
 0x405   :  { %1793 = vmatprep.subr.bf16.mxu0 %v1792_v22 }
 0x408   :  { %1795 = vmatpush3.bf16.msra.mxu0 %v1792_v22  ;;  %v840_v22 = vld [vmem:[%s2102_s2 + $0x10] sm:$0xff]  ;;  %s1921_s2 = smov [#allocation5]  }
 0x409   :  { %1797 = vmatprep.subr.bf16.mxu0 %v1796_v28  ;;  %s1154_s18 = sshll.u32 %s1921_s2, 4  ;;  %s1155_s18 = int_to_ptr.vmem [resolvable:$true] %s1154_s18 }
 0x40a   :  { %s1887_s19 = scalar_lea.vmem %s1155_s18, 384  ;;  %p1892_p9 = scmp.lt.s32.totalorder %s1155_s18, %s1155_s18 }
 0x40b   :  { %p1888_p8 = scmp.ne.s32.totalorder %s1155_s18, %s1887_s19  ;;  %p1893_p10 = scmp.lt.s32.totalorder %s1887_s19, %s1887_s19 }
 0x40c   :  { %1799 = vmatpush3.bf16.msra.mxu0 %v1796_v28  ;;  %v939_v28 = vld [vmem:[#allocation2 + $0x2c8] sm:$0xff] }
 0x40d   :  { %1801 = vmatprep.subr.bf16.mxu0 %v1800_v31  ;;  %v1820_v29 = vpack.c.bf16 %v939_v28, %v938_v27  ;;  %p1894_p11 = por %p1893_p10, %p1892_p9 }
 0x40f   :  { %p1895_p12 = pnand %p1894_p11, %p1888_p8 }
 0x410   :  { %1803 = vmatpush3.bf16.msra.mxu0 %v1800_v31  ;;  %v941_v31 = vld [vmem:[#allocation2 + $0x2d8] sm:$0xff] }
 0x411   :  { %1831 = vmatprep.subr.bf16.mxu0 %v1918_v35 }
 0x4d3   :  { %v1483_v23 = vpop.f32.mrb[6].mxu1 }
 0x4d4   :  { %v596_v24 = vpop.f32.mrb[7].mxu1 }
 0x4d5   :  { %v1764_v25 = vpack.c.bf16 %v1483_v23, %v596_v24  ;;  %v1814_v23 = vpack.c.bf16 %v935_v21, %v934_v20  ;;  %v936_v24 = vld [vmem:[#allocation2 + $0x2b0] sm:$0xff] }
 0x4d7   :  { %1765 = vmatprep.subr.bf16.mxu1 %v1764_v25 }
 0x4d8   :  { %1767 = vmatpush3.bf16.msra.mxu1 %v1764_v25 }
 0x4d9   :  { %1769 = vmatprep.subr.bf16.mxu1 %v1764_v25 }
 0x4db   :  { %1489 = vmatmul.mubr.msk.f32.vlgmr.msra.gmra.mrb[8].mxu1 %vm251_vm2, %v1983_v16 }
 0x4dc   :  { %1771 = vmatpush3.bf16.msra.mxu1 %v1764_v25  ;;  %1495 = vmatprep.mubr.msk.f32.mxu1 %vm251_vm2, %v1988_v17  ;;  %v937_v25 = vld [vmem:[#allocation2 + $0x2b8] sm:$0xff] }
 0x4dd   :  { %1804 = vmatprep.subr.bf16.mxu1 %v1918_v35  ;;  %v1817_v26 = vpack.c.bf16 %v937_v25, %v936_v24 }
 0x4df   :  { %1496 = vmatmul.mubr.msk.f32.vlgmr.msra.gmra.mrb[10].mxu1 %vm251_vm2, %v1997_v18 }
 0x4e0   :  { %1537 = vmatprep.mubr.msk.f32.mxu1 %vm1919_vm4, %v1920_v36 }
 0x5ae   :  { %v1490_v32 = vpop.f32.mrb[8].mxu1 }
 0x5af   :  { %v671_v33 = vpop.f32.mrb[9].mxu1 }
 0x5b2   :  { %v1497_v16 = vpop.f32.mrb[10].mxu1 }
 0x5b3   :  { %v756_v34 = vsel %vm414_vm3, %v1490_v32, %v1497_v16  ;;  %v746_v17 = vpop.f32.mrb[11].mxu1  ;;  %v1823_v32 = vpack.c.bf16 %v941_v31, %v940_v30  ;;  %v943_v16 = vld [vmem:[#allocation2 + $0x2e8] sm:$0xff] }
 0x5b4   :  { %v755_v18 = vsel %vm414_vm3, %v671_v33, %v746_v17  ;;  %v942_v33 = vld [vmem:[#allocation2 + $0x2e0] sm:$0xff]  ;;  %v944_v17 = vld [vmem:[#allocation2 + $0x2f0] sm:$0xff] }
 0x5b5   :  { %1530 = vmatprep.mubr.f32.mxu0 %v755_v18  ;;  %v945_v18 = vld [vmem:[#allocation2 + $0x2f8] sm:$0xff] }
 0x5b6   :  { %1531 = vmatmul.mubr.f32.vlgmr.msra.gmra.mrb[4].mxu0 %v756_v34  ;;  %v1826_v34 = vpack.c.bf16 %v943_v16, %v942_v33  ;;  %v1829_v37 = vpack.c.bf16 %v945_v18, %v944_v17 }
 0x5b7   :  { %1619 = vmatprep.mubr.msk.f32.mxu0 %vm1919_vm4, %v1920_v36  ;;  %1833 = vmatpush3.bf16.msra.mxu0 %v1832_v39 }
 0x5b8   :  { %1834 = vmatprep.subr.bf16.mxu0 %v1918_v35 }
 0x5bb   :  { %1836 = vmatpush3.bf16.msra.mxu0 %v1835_v42 }
 0x5bc   :  { %1837 = vmatprep.subr.bf16.mxu0 %v1918_v35 }
 0x5bf   :  { %1839 = vmatpush3.bf16.msra.mxu0 %v1838_v45  ;;  %v1049_v45 = vrot.slane %v2010_v60, %v1048_v43 }
 0x5c0   :  { %1840 = vmatprep.subr.bf16.mxu0 %v1918_v35 }
 0x5c3   :  { %1842 = vmatpush3.bf16.msra.mxu0 %v1841_v48 }
 0x5c4   :  { %1843 = vmatprep.subr.bf16.mxu0 %v1918_v35 }
 0x5c7   :  { %1845 = vmatpush3.bf16.msra.mxu0 %v1844_v53 }
 0x5c8   :  { %1846 = vmatprep.subr.bf16.mxu0 %v1918_v35 }
 0x5cb   :  { %1848 = vmatpush3.bf16.msra.mxu0 %v1847_v56 }
 0x5cc   :  { %1849 = vmatprep.subr.bf16.mxu0 %v1918_v35 }
 0x5cf   :  { %1851 = vmatpush3.bf16.msra.mxu0 %v1850_v62 }
 0x5d0   :  { %1852 = vmatprep.subr.bf16.mxu0 %v1918_v35 }
 0x5d3   :  { %1854 = vmatpush3.bf16.msra.mxu0 %v1853_v1 }
 0x689   :  { %v1532_v4 = vpop.f32.mrb[4].mxu0 }
 0x68a   :  { %v833_v51 = vadd.f32 %v1532_v4, %v760_v3  ;;  %v827_v5 = vpop.f32.mrb[5].mxu0 }
 0x68b   :  { %v828_v6 = vadd.f32 %v827_v5, %v760_v3 }
 0x68c   :  { %v837_v7 = vmax.f32 %v833_v51, 0.0 }
 0x68d   :  { %v836_v8 = vmax.f32 %v828_v6, 0.0 }
 0x68f   :  { %v1805_v11 = vpack.c.bf16 %v837_v7, %v836_v8 }
 0x691   :  { %1806 = vmatpush3.bf16.msra.mxu1 %v1805_v11 }
 0x692   :  { %1807 = vmatprep.subr.bf16.mxu1 %v1918_v35 }
 0x694   :  { %1538 = vmatmul.mubr.msk.f32.vlgmr.msra.gmra.mrb[12].mxu1 %vm251_vm2, %v838_v12 }
 0x695   :  { %1540 = vmatprep.mubr.msk.f32.mxu1 %vm1919_vm4, %v1920_v36  ;;  %1809 = vmatpush3.bf16.msra.mxu1 %v1808_v13 }
 0x696   :  { %1810 = vmatprep.subr.bf16.mxu1 %v1918_v35 }
 0x698   :  { %1541 = vmatmul.mubr.msk.f32.gmra.mrb[14].mxu1 %vm251_vm2, %v839_v19 }
 0x699   :  { %1543 = vmatprep.mubr.msk.f32.mxu1 %vm1919_vm4, %v1920_v36  ;;  %1812 = vmatpush3.bf16.msra.mxu1 %v1811_v58 }
 0x69a   :  { %1813 = vmatprep.subr.bf16.mxu1 %v1918_v35 }
 0x69c   :  { %1544 = vmatmul.mubr.msk.f32.gmra.mrb[16].mxu1 %vm251_vm2, %v840_v22 }
 0x69d   :  { %1815 = vmatpush3.bf16.msra.mxu1 %v1814_v23  ;;  %1578 = vmatprep.mubr.msk.f32.mxu1 %vm1919_vm4, %v1920_v36 }
 0x69e   :  { %1816 = vmatprep.subr.bf16.mxu1 %v1918_v35 }
 0x6a1   :  { %1818 = vmatpush3.bf16.msra.mxu1 %v1817_v26 }
 0x6a2   :  { %1819 = vmatprep.subr.bf16.mxu1 %v1918_v35 }
 0x6a5   :  { %1821 = vmatpush3.bf16.msra.mxu1 %v1820_v29 }
 0x6a6   :  { %1822 = vmatprep.subr.bf16.mxu1 %v1918_v35 }
 0x6a9   :  { %1824 = vmatpush3.bf16.msra.mxu1 %v1823_v32 }
 0x6aa   :  { %1825 = vmatprep.subr.bf16.mxu1 %v1918_v35 }
 0x6ad   :  { %1827 = vmatpush3.bf16.msra.mxu1 %v1826_v34 }
 0x6ae   :  { %1828 = vmatprep.subr.bf16.mxu1 %v1918_v35 }
 0x6b1   :  { %1830 = vmatpush3.bf16.msra.mxu1 %v1829_v37 }
 0x767   :  { %v916_v38 = vpop.f32.mrb[12].mxu1 }
 0x768   :  { %v1539_v39 = vpop.f32.mrb[13].mxu1  ;;  %1579 = vmatmul.mubr.f32.vlgmr.msra.gmra.mrb[18].mxu1 %v916_v38  ;;  %1620 = vmatmul.mubr.f32.vlgmr.msra.gmra.mrb[6].mxu0 %v916_v38 }
 0x769   :  { %1581 = vmatprep.mubr.msk.f32.mxu1 %vm1919_vm4, %v1920_v36  ;;  %1622 = vmatprep.mubr.msk.f32.mxu0 %vm1919_vm4, %v1920_v36 }
 0x76b   :  { %v921_v40 = vpop.f32.mrb[14].mxu1 }
 0x76c   :  { %v1542_v41 = vpop.f32.mrb[15].mxu1  ;;  %1582 = vmatmul.mubr.f32.gmra.mrb[20].mxu1 %v921_v40  ;;  %1623 = vmatmul.mubr.f32.gmra.mrb[8].mxu0 %v921_v40 }
 0x76d   :  { %1584 = vmatprep.mubr.msk.f32.mxu1 %vm1919_vm4, %v1920_v36  ;;  %1625 = vmatprep.mubr.msk.f32.mxu0 %vm1919_vm4, %v1920_v36 }
 0x76f   :  { %v926_v35 = vpop.f32.mrb[16].mxu1 }
 0x770   :  { %v1545_v42 = vpop.f32.mrb[17].mxu1  ;;  %1585 = vmatmul.mubr.f32.gmra.mrb[22].mxu1 %v926_v35  ;;  %1626 = vmatmul.mubr.f32.gmra.mrb[10].mxu0 %v926_v35 }
 0x83b   :  { %v1032_v47 = vpop.f32.mrb[18].mxu1  ;;  %v1116_v48 = vpop.f32.mrb[6].mxu0 }
 0x83c   :  { %v1117_v49 = vadd.f32 %v1116_v48, %v1049_v45  ;;  %v1580_v50 = vpop.f32.mrb[19].mxu1  ;;  %v1621_v53 = vpop.f32.mrb[7].mxu0  ;;  %v1033_v36 = vadd.f32 %v1032_v47, %v965_v46 }
 0x83e   :  { %v1134_v54 = vmax.f32 %v1117_v49, 0.0 }
 0x83f   :  { %v1037_v55 = vpop.f32.mrb[20].mxu1  ;;  %v1121_v56 = vpop.f32.mrb[8].mxu0 }
 0x840   :  { %v1137_v59 = vsel %vm414_vm3, %v1117_v49, %v1134_v54  ;;  %v1122_v61 = vadd.f32 %v1121_v56, %v1049_v45  ;;  %v1583_v62 = vpop.f32.mrb[21].mxu1  ;;  %v1624_v63 = vpop.f32.mrb[9].mxu0 }
 0x841   :  { %v1143_v0 = vsel %vm1140_vm5, %v1033_v36, %v1137_v59 }
 0x842   :  { %v1135_v1 = vmax.f32 %v1122_v61, 0.0  ;;  %1146 = vst [vmem:[#allocation5] sm:$0xff] %v1143_v0 }
 0x843   :  { %v1042_v60 = vpop.f32.mrb[22].mxu1  ;;  %v1126_v2 = vpop.f32.mrb[10].mxu0 }
 0x844   :  { %v1138_v3 = vsel %vm414_vm3, %v1122_v61, %v1135_v1  ;;  %v1127_v4 = vadd.f32 %v1126_v2, %v1049_v45  ;;  %v1586_v51 = vpop.f32.mrb[23].mxu1  ;;  %v1627_v57 = vpop.f32.mrb[11].mxu0 }
 0x845   :  { %1147 = vst [vmem:[#allocation5 + $0x8] sm:$0xff] %v1138_v3 }
 0x846   :  { %v1136_v5 = vmax.f32 %v1127_v4, 0.0 }
 0x848   :  { %v1139_v6 = vsel %vm414_vm3, %v1127_v4, %v1136_v5 }
 0x849   :  { %1148 = vst [vmem:[#allocation5 + $0x10] sm:$0xff] %v1139_v6 }
 0x84a   :  { %1898 = shalt.err (!%p1895_p12)
}
 0x84b   :  { %s1899_s22 = scalar_lea.hbm %s2104_s4, 384 }
 0x84c   :  { %p1900_p13 = scmp.ne.s32.totalorder %s2104_s4, %s1899_s22  ;;  %p1903_p0 = scmp.lt.u32.totalorder %s1899_s22, %s2104_s4 }
 0x84e   :  { %p1905_p1 = pnand %p1903_p0, %p1900_p13 }
 0x850   :  { %1908 = shalt.err (!%p1905_p1)
}
 0x851   :  { %1160 = dma.vmem_to_hbm [thread:$0]  %s1155_s18, 384, %s2104_s4, [#allocation4], %s1914_s25, %s1914_s25, %s1915_s26  }
 0x852   :  { %1911 = dma.done.wait [#allocation4], 384  }
 0x853   :  { %1912 = vsyncadd [#allocation4], 4294966912 }
 0x854   :  { %1164 = vsyncpa [#allocation3], 1 }
 0x855   :  { %1165 = vsyncpa [#allocation4], 1 }

</bundles_post_ra>
